<compile_context>
chip_gen: v6e
topology: v6e:2x2x1
jax: 0.10.0
libtpu: 0.0.40
codegen_flags: <defaults>
</compile_context>

<pallas_src>
import jax
import jax.numpy as jnp
from jax.experimental import pallas as pl
from jax.experimental.pallas import tpu as pltpu

NEG_SLOPE = 0.2
NEG_INF = -1e30  # f32 only; softmax path is kept in f32 (bf16 can't hold this)


def _round_up(v, m):
    return ((v + m - 1) // m) * m


def _choose_tiling(n_nodes):
    """Pick (padded node count Np, destination-row tile TILE_M).

    Np is a multiple of 128 (lane dim of adj / a_src_row) and of TILE_M.
    TILE_M is sized so one tile's working set (double-buffered int8 adj tile
    plus a few f32 [TILE_M, Np] softmax temporaries) stays well inside the
    48 MiB scoped-VMEM budget we request (safe on v7x's 64 MiB physical VMEM).
    """
    np0 = max(128, _round_up(n_nodes, 128))
    budget = 24 * 1024 * 1024  # bytes for the per-tile [TILE_M, Np] working set
    # ~14 bytes per (dst-row, src-node) cell: 3 f32 temporaries + 2x int8 adj.
    rows = max(128, (budget // (np0 * 14)) // 128 * 128)
    tile_m = min(512, np0, rows)
    np_pad = max(_round_up(n_nodes, tile_m), 128)
    return np_pad, tile_m


def _pad2(a, rows, cols):
    r, c = a.shape
    return jnp.pad(a, ((0, rows - r), (0, cols - c)))


def _make_linear_kernel(use_vpu_matmul):
    """h = x @ W, a_src = h.att_src, a_dst = h.att_dst (per row tile)."""

    def kernel(x_ref, w_ref, att_src_ref, att_dst_ref,
               h_ref, asrc_row_ref, adst_col_ref):
        # x_ref:        [T, Fin]      (Fin unpadded when tiny)
        # w_ref:        [Fin, Fout_p]
        # att_*_ref:    [1, Fout_p]
        # h_ref:        [T, Fout_p]   bf16 out (aggregation operand)
        # asrc_row_ref: [1, T]        f32 out (lane-dense row of a_src)
        # adst_col_ref: [T, 1]        f32 out
        if use_vpu_matmul:
            # Tiny contracting dim: unrolled VPU FMA instead of a 128-padded
            # MXU matmul (keeps x at its natural width in HBM/VMEM).
            x = x_ref[...]
            h = jnp.zeros(h_ref.shape, jnp.float32)
            for k in range(x_ref.shape[-1]):
                h = h + x[:, k:k + 1] * w_ref[k:k + 1, :]
        else:
            h = jnp.dot(x_ref[...], w_ref[...],
                        preferred_element_type=jnp.float32)

        a_src = jnp.sum(h * att_src_ref[...], axis=-1, keepdims=True)  # [T,1]
        a_dst = jnp.sum(h * att_dst_ref[...], axis=-1, keepdims=True)  # [T,1]

        h_ref[...] = h.astype(h_ref.dtype)
        # One-time transpose here (per row tile) so the attention kernel never
        # has to do a sublane->lane shuffle in its hot loop.
        asrc_row_ref[...] = a_src.T
        adst_col_ref[...] = a_dst

    return kernel


def _gat_softmax_agg_kernel(h_ref, asrc_row_ref, adst_ref, bias_ref, adj_ref,
                            out_ref):
    # h_ref:        [Np, Fout_p] bf16   all source-node features (resident)
    # asrc_row_ref: [1, Np]      f32
    # adst_ref:     [T, 1]       f32    destination tile
    # bias_ref:     [1, Fout_p]  f32
    # adj_ref:      [T, Np]      int8   adj[i, j] = 1 if edge j -> i (+ self loop)
    # out_ref:      [T, Fout_p]  f32

    # e[i, j] = leaky_relu(a_dst[i] + a_src[j])  (f32 throughout the softmax)
    e = adst_ref[...] + asrc_row_ref[...]
    e = jnp.where(e > 0, e, NEG_SLOPE * e)
    e = jnp.where(adj_ref[...] != 0, e, NEG_INF)

    # Masked softmax over source nodes j.
    # Padded destination rows have an all-zero adj row -> alpha collapses to a
    # uniform 1/Np and the output row is garbage; it is sliced off by [:N]
    # in the wrapper, so this is benign (do NOT keep those rows if retiling).
    m = jnp.max(e, axis=-1, keepdims=True)
    p = jnp.exp(e - m)
    denom = jnp.sum(p, axis=-1, keepdims=True)
    alpha = p * pl.reciprocal(denom, approx=True)

    # Aggregate neighbours on the MXU: bf16 inputs, f32 accumulation.
    out = jnp.dot(alpha.astype(jnp.bfloat16), h_ref[...],
                  preferred_element_type=jnp.float32)
    out_ref[...] = jnp.maximum(out + bias_ref[...], 0.0)


def encoder_forward(x, edge_index, params):
    """Pallas implementation of Encoder.forward.

    Args:
      x:          [N, F_in] float32 node features.
      edge_index: [2, E] int32 (row 0 = source, row 1 = target).
      params:     dict with 'W' [F_in, 32], 'att_src' [32], 'att_dst' [32],
                  'bias' [32].
    Returns:
      (relu(GATConv(x, edge_index)), edge_index)
    """
    N, F_in = x.shape
    F_out = params["W"].shape[1]
    Fout_p = max(128, _round_up(F_out, 128))

    Np, tile_m = _choose_tiling(N)
    grid = (Np // tile_m,)

    # For tiny F_in, keep x at natural width and use the unrolled VPU matmul;
    # otherwise pad the contracting dim for the MXU path.
    use_vpu = F_in <= 16
    Fin_k = F_in if use_vpu else _round_up(F_in, 128)

    f32 = jnp.float32
    x_p = _pad2(x.astype(f32), Np, Fin_k)
    w_p = _pad2(params["W"].astype(f32), Fin_k, Fout_p)
    asrc_p = _pad2(params["att_src"].astype(f32).reshape(1, F_out), 1, Fout_p)
    adst_p = _pad2(params["att_dst"].astype(f32).reshape(1, F_out), 1, Fout_p)
    bias_p = _pad2(params["bias"].astype(f32).reshape(1, F_out), 1, Fout_p)

    # Dense int8 adjacency with self loops at padded size: adj[dst, src] = 1.
    # NOTE: duplicate edges are deduplicated by the mask (PyG's edge-list
    # softmax would count them separately; semantics differ for multigraphs).
    src, dst = edge_index[0].astype(jnp.int32), edge_index[1].astype(jnp.int32)
    adj = jnp.zeros((Np, Np), jnp.int8)
    adj = adj.at[dst, src].set(jnp.int8(1))
    diag = jnp.arange(N)
    adj = adj.at[diag, diag].set(jnp.int8(1))

    # --- Kernel 1: linear transform + attention scalars (row-tiled, parallel).
    h_bf16, a_src_row, a_dst_col = pl.pallas_call(
        _make_linear_kernel(use_vpu),
        out_shape=(jax.ShapeDtypeStruct((Np, Fout_p), jnp.bfloat16),
                   jax.ShapeDtypeStruct((1, Np), jnp.float32),
                   jax.ShapeDtypeStruct((Np, 1), jnp.float32)),
        grid_spec=pltpu.PrefetchScalarGridSpec(
            num_scalar_prefetch=0,
            grid=grid,
            in_specs=[pl.BlockSpec((tile_m, Fin_k), lambda i: (i, 0)),
                      pl.BlockSpec((Fin_k, Fout_p), lambda i: (0, 0)),
                      pl.BlockSpec((1, Fout_p), lambda i: (0, 0)),
                      pl.BlockSpec((1, Fout_p), lambda i: (0, 0))],
            out_specs=[pl.BlockSpec((tile_m, Fout_p), lambda i: (i, 0)),
                       pl.BlockSpec((1, tile_m), lambda i: (0, i)),
                       pl.BlockSpec((tile_m, 1), lambda i: (i, 0))]),
        compiler_params=pltpu.CompilerParams(
            dimension_semantics=("parallel",)),
    )(x_p, w_p, asrc_p, adst_p)

    # --- Kernel 2: masked softmax + aggregation, tiled over destination rows.
    out_p = pl.pallas_call(
        _gat_softmax_agg_kernel,
        out_shape=jax.ShapeDtypeStruct((Np, Fout_p), jnp.float32),
        grid_spec=pltpu.PrefetchScalarGridSpec(
            num_scalar_prefetch=0,
            grid=grid,
            in_specs=[pl.BlockSpec((Np, Fout_p), lambda i: (0, 0)),   # h (all src)
                      pl.BlockSpec((1, Np), lambda i: (0, 0)),        # a_src row
                      pl.BlockSpec((tile_m, 1), lambda i: (i, 0)),    # a_dst tile
                      pl.BlockSpec((1, Fout_p), lambda i: (0, 0)),    # bias
                      pl.BlockSpec((tile_m, Np), lambda i: (i, 0))],  # adj tile
            out_specs=pl.BlockSpec((tile_m, Fout_p), lambda i: (i, 0))),
        compiler_params=pltpu.CompilerParams(
            dimension_semantics=("parallel",),
            vmem_limit_bytes=48 * 1024 * 1024),
    )(h_bf16, a_src_row, a_dst_col, bias_p, adj)

    return out_p[:N, :F_out], edge_index


def init_params(key, input_channel, out_channels=32):
    k1, k2, k3 = jax.random.split(key, 3)
    # Glorot-style init (deterministic via the provided key).
    scale_w = (2.0 / (input_channel + out_channels)) ** 0.5
    scale_a = (2.0 / (1 + out_channels)) ** 0.5
    return {
        "W": scale_w * jax.random.normal(k1, (input_channel, out_channels),
                                         jnp.float32),
        "att_src": scale_a * jax.random.normal(k2, (out_channels,), jnp.float32),
        "att_dst": scale_a * jax.random.normal(k3, (out_channels,), jnp.float32),
        "bias": jnp.zeros((out_channels,), jnp.float32),
    }


if __name__ == "__main__":
    key = jax.random.PRNGKey(0)
    k_x, k_p = jax.random.split(key)

    N, input_channel = 8, 4
    x = jax.random.normal(k_x, (N, input_channel), jnp.float32)

    # Deterministic small edge set (directed, src -> dst): a ring + chords.
    src = jnp.array([0, 1, 2, 3, 4, 5, 6, 7, 0, 2, 4, 6], jnp.int32)
    dst = jnp.array([1, 2, 3, 4, 5, 6, 7, 0, 4, 6, 0, 2], jnp.int32)
    edge_index = jnp.stack([src, dst], axis=0)  # [2, E]

    params = init_params(k_p, input_channel, 32)

    out, ei = encoder_forward(x, edge_index, params)
    jax.block_until_ready(out)
    jax.block_until_ready(ei)

    assert out.shape == (N, 32) and ei.shape == edge_index.shape
    assert bool(jnp.all(out >= 0.0)) and bool(jnp.all(jnp.isfinite(out)))
    print("KERNEL_OK")
</pallas_src>

<mosaic_0001>
module attributes {stable_mosaic.version = 11 : i64} {
  func.func @kernel(%arg0: i32, %arg1: memref<128x4xf32, #tpu.memory_space<vmem>>, %arg2: memref<4x128xf32, #tpu.memory_space<vmem>>, %arg3: memref<1x128xf32, #tpu.memory_space<vmem>>, %arg4: memref<1x128xf32, #tpu.memory_space<vmem>>, %arg5: memref<128x128xbf16, #tpu.memory_space<vmem>>, %arg6: memref<1x128xf32, #tpu.memory_space<vmem>>, %arg7: memref<128x1xf32, #tpu.memory_space<vmem>>) attributes {dimension_semantics = [#tpu.dimension_semantics<parallel>], iteration_bounds = array<i64: 1>, scalar_prefetch = 0 : i64, scratch_operands = 0 : i64, tpu.core_type = #tpu.core_type<tc>, window_params = [{transform_indices = @transform_0, window_bounds = array<i64: 128, 4>}, {pipeline_mode = #tpu.pipeline_mode<synchronous>, transform_indices = @transform_1, window_bounds = array<i64: 4, 128>}, {pipeline_mode = #tpu.pipeline_mode<synchronous>, transform_indices = @transform_2, window_bounds = array<i64: 1, 128>}, {pipeline_mode = #tpu.pipeline_mode<synchronous>, transform_indices = @transform_3, window_bounds = array<i64: 1, 128>}, {transform_indices = @transform_4, window_bounds = array<i64: 128, 128>}, {transform_indices = @transform_5, window_bounds = array<i64: 1, 128>}, {transform_indices = @transform_6, window_bounds = array<i64: 128, 1>}]} {
    %c0 = arith.constant 0 : index
    %c0_0 = arith.constant 0 : index
    %0 = vector.load %arg1[%c0, %c0_0] : memref<128x4xf32, #tpu.memory_space<vmem>>, vector<128x4xf32>
    %cst = arith.constant 0.000000e+00 : f32
    %1 = vector.broadcast %cst : f32 to vector<128x128xf32>
    %2 = vector.extract_strided_slice %0 {offsets = [0, 0], sizes = [128, 1], strides = [1, 1]} : vector<128x4xf32> to vector<128x1xf32>
    %c0_1 = arith.constant 0 : index
    %c0_2 = arith.constant 0 : index
    %3 = vector.load %arg2[%c0_1, %c0_2] : memref<4x128xf32, #tpu.memory_space<vmem>>, vector<1x128xf32>
    %4 = vector.broadcast %2 : vector<128x1xf32> to vector<128x128xf32>
    %5 = vector.broadcast %3 : vector<1x128xf32> to vector<128x128xf32>
    %6 = arith.mulf %4, %5 : vector<128x128xf32>
    %7 = arith.addf %1, %6 : vector<128x128xf32>
    %8 = vector.extract_strided_slice %0 {offsets = [0, 1], sizes = [128, 1], strides = [1, 1]} : vector<128x4xf32> to vector<128x1xf32>
    %c1 = arith.constant 1 : index
    %c0_3 = arith.constant 0 : index
    %9 = vector.load %arg2[%c1, %c0_3] : memref<4x128xf32, #tpu.memory_space<vmem>>, vector<1x128xf32>
    %10 = vector.broadcast %8 : vector<128x1xf32> to vector<128x128xf32>
    %11 = vector.broadcast %9 : vector<1x128xf32> to vector<128x128xf32>
    %12 = arith.mulf %10, %11 : vector<128x128xf32>
    %13 = arith.addf %7, %12 : vector<128x128xf32>
    %14 = vector.extract_strided_slice %0 {offsets = [0, 2], sizes = [128, 1], strides = [1, 1]} : vector<128x4xf32> to vector<128x1xf32>
    %c2 = arith.constant 2 : index
    %c0_4 = arith.constant 0 : index
    %15 = vector.load %arg2[%c2, %c0_4] : memref<4x128xf32, #tpu.memory_space<vmem>>, vector<1x128xf32>
    %16 = vector.broadcast %14 : vector<128x1xf32> to vector<128x128xf32>
    %17 = vector.broadcast %15 : vector<1x128xf32> to vector<128x128xf32>
    %18 = arith.mulf %16, %17 : vector<128x128xf32>
    %19 = arith.addf %13, %18 : vector<128x128xf32>
    %20 = vector.extract_strided_slice %0 {offsets = [0, 3], sizes = [128, 1], strides = [1, 1]} : vector<128x4xf32> to vector<128x1xf32>
    %c3 = arith.constant 3 : index
    %c0_5 = arith.constant 0 : index
    %21 = vector.load %arg2[%c3, %c0_5] : memref<4x128xf32, #tpu.memory_space<vmem>>, vector<1x128xf32>
    %22 = vector.broadcast %20 : vector<128x1xf32> to vector<128x128xf32>
    %23 = vector.broadcast %21 : vector<1x128xf32> to vector<128x128xf32>
    %24 = arith.mulf %22, %23 : vector<128x128xf32>
    %25 = arith.addf %19, %24 : vector<128x128xf32>
    %c0_6 = arith.constant 0 : index
    %c0_7 = arith.constant 0 : index
    %26 = vector.load %arg3[%c0_6, %c0_7] : memref<1x128xf32, #tpu.memory_space<vmem>>, vector<1x128xf32>
    %27 = vector.broadcast %26 : vector<1x128xf32> to vector<128x128xf32>
    %28 = arith.mulf %25, %27 : vector<128x128xf32>
    %cst_8 = arith.constant dense<0.000000e+00> : vector<128xf32>
    %29 = vector.multi_reduction <add>, %28, %cst_8 [1] : vector<128x128xf32> to vector<128xf32>
    %30 = vector.shape_cast %29 : vector<128xf32> to vector<128x1xf32>
    %c0_9 = arith.constant 0 : index
    %c0_10 = arith.constant 0 : index
    %31 = vector.load %arg4[%c0_9, %c0_10] : memref<1x128xf32, #tpu.memory_space<vmem>>, vector<1x128xf32>
    %32 = vector.broadcast %31 : vector<1x128xf32> to vector<128x128xf32>
    %33 = arith.mulf %25, %32 : vector<128x128xf32>
    %cst_11 = arith.constant dense<0.000000e+00> : vector<128xf32>
    %34 = vector.multi_reduction <add>, %33, %cst_11 [1] : vector<128x128xf32> to vector<128xf32>
    %35 = vector.shape_cast %34 : vector<128xf32> to vector<128x1xf32>
    %36 = arith.truncf %25 : vector<128x128xf32> to vector<128x128xbf16>
    %c0_12 = arith.constant 0 : index
    %c0_13 = arith.constant 0 : index
    %37 = vector.load %arg5[%c0_12, %c0_13] : memref<128x128xbf16, #tpu.memory_space<vmem>>, vector<128x128xbf16>
    tpu.vector_store %arg5[%c0_12, %c0_13], %36 {strides = array<i32>} : memref<128x128xbf16, #tpu.memory_space<vmem>>, vector<128x128xbf16>,
    %38 = tpu.transpose %30, [1, 0] : vector<128x1xf32> -> vector<1x128xf32>
    %c0_14 = arith.constant 0 : index
    %c0_15 = arith.constant 0 : index
    %39 = vector.load %arg6[%c0_14, %c0_15] : memref<1x128xf32, #tpu.memory_space<vmem>>, vector<1x128xf32>
    tpu.vector_store %arg6[%c0_14, %c0_15], %38 {strides = array<i32>} : memref<1x128xf32, #tpu.memory_space<vmem>>, vector<1x128xf32>,
    %c0_16 = arith.constant 0 : index
    %c0_17 = arith.constant 0 : index
    %40 = vector.load %arg7[%c0_16, %c0_17] : memref<128x1xf32, #tpu.memory_space<vmem>>, vector<128x1xf32>
    tpu.vector_store %arg7[%c0_16, %c0_17], %35 {strides = array<i32>} : memref<128x1xf32, #tpu.memory_space<vmem>>, vector<128x1xf32>,
    return
  }
  func.func @transform_0(%arg0: i32) -> (i32, i32) {
    %c0_i32 = arith.constant 0 : i32
    %c0_i32_0 = arith.constant 0 : i32
    return %arg0, %c0_i32 : i32, i32
  }
  func.func @transform_1(%arg0: i32) -> (i32, i32) {
    %c0_i32 = arith.constant 0 : i32
    %c0_i32_0 = arith.constant 0 : i32
    %c0_i32_1 = arith.constant 0 : i32
    return %c0_i32, %c0_i32_0 : i32, i32
  }
  func.func @transform_2(%arg0: i32) -> (i32, i32) {
    %c0_i32 = arith.constant 0 : i32
    %c0_i32_0 = arith.constant 0 : i32
    %c0_i32_1 = arith.constant 0 : i32
    return %c0_i32, %c0_i32_0 : i32, i32
  }
  func.func @transform_3(%arg0: i32) -> (i32, i32) {
    %c0_i32 = arith.constant 0 : i32
    %c0_i32_0 = arith.constant 0 : i32
    %c0_i32_1 = arith.constant 0 : i32
    return %c0_i32, %c0_i32_0 : i32, i32
  }
  func.func @transform_4(%arg0: i32) -> (i32, i32) {
    %c0_i32 = arith.constant 0 : i32
    %c0_i32_0 = arith.constant 0 : i32
    return %arg0, %c0_i32 : i32, i32
  }
  func.func @transform_5(%arg0: i32) -> (i32, i32) {
    %c0_i32 = arith.constant 0 : i32
    %c0_i32_0 = arith.constant 0 : i32
    return %c0_i32, %arg0 : i32, i32
  }
  func.func @transform_6(%arg0: i32) -> (i32, i32) {
    %c0_i32 = arith.constant 0 : i32
    %c0_i32_0 = arith.constant 0 : i32
    return %arg0, %c0_i32 : i32, i32
  }
}

</mosaic_0001>

<bundles_post_ra>
// kernel: tpu_custom_call.1
= control target key start
LH: loop header
LB: loop body
LE: loop exit
PB: predicated region body
PF: predicated region fallthrough
CT: control target
= control target key end

     0   :  { %12 = vsyncpa [#allocation3], 0  ;;  %v879_v2 = vmov 0   ;;  %s1371_s0 = inlined_call_operand.vmem [shape: f32[128,4], index: 0, kind: input, shape index: {}]   ;;  %s1372_s1 = inlined_call_operand.vmem [shape: f32[4,128], index: 1, kind: input, shape index: {}]   ;;  %s1373_s2 = inlined_call_operand.vmem [shape: f32[1,128], index: 2, kind: input, shape index: {}]   ;;  %s1374_s3 = inlined_call_operand.vmem [shape: f32[1,128], index: 3, kind: input, shape index: {}]   ;;  %s1375_s4 = inlined_call_operand.hbm [shape: bf16[128,128], index: 4, kind: output, shape index: {0}]   ;;  %s1376_s5 = inlined_call_operand.hbm [shape: f32[1,128], index: 5, kind: output, shape index: {1}]   ;;  %s1377_s6 = inlined_call_operand.vmem [shape: f32[128,1], index: 6, kind: output, shape index: {2}]  }
   0x1   :  { %v925_v0 = vld [vmem:[%s1371_s0 + $0x10] sm:$0xff]  ;;  %v930_v1 = vld [vmem:[%s1371_s0] sm:$0xff]  ;;  %826 = vset.pattern.permute.xlu1 %v879_v2  ;;  %825 = vset.pattern.permute.xlu0 %v879_v2  ;;  %v937_v3 = vld [vmem:[%s1371_s0 + $0x18] sm:$0xff] }
   0x2   :  { %51 = vperm.xlu1 %826, %v925_v0   ;;  %41 = vperm.xlu0 %825, %v930_v1   ;;  %v942_v4 = vld [vmem:[%s1371_s0 + $0x8] sm:$0xff] }
   0x3   :  { %13 = vsyncpa [#allocation5], 0  ;;  %v949_v5 = vld [vmem:[%s1371_s0 + $0x28] sm:$0xff]  ;;  %v954_v6 = vld [vmem:[%s1371_s0 + $0x20] sm:$0xff]  ;;  %v880_v17 = vmov 1   ;;  %v881_v18 = vmov 2  }
   0x4   :  { %v961_v7 = vld [vmem:[%s1371_s0 + $0x38] sm:$0xff]  ;;  %v966_v8 = vld [vmem:[%s1371_s0 + $0x30] sm:$0xff]  ;;  %v973_v9 = vld [vmem:[%s1371_s0 + $0x48] sm:$0xff]  ;;  %v882_v19 = vmov 3  }
   0x5   :  { %v978_v10 = vld [vmem:[%s1371_s0 + $0x40] sm:$0xff]  ;;  %v33_v11 = vld [vmem:[%s1371_s0 + $0x58] sm:$0xff]  ;;  %v32_v12 = vld [vmem:[%s1371_s0 + $0x50] sm:$0xff] }
   0x6   :  { %56 = vperm.xlu1 %826, %v937_v3   ;;  %46 = vperm.xlu0 %825, %v942_v4   ;;  %v991_v13 = vld [vmem:[%s1371_s0 + $0x68] sm:$0xff]  ;;  %v34_v14 = vld [vmem:[%s1371_s0 + $0x60] sm:$0xff]  ;;  %v1000_v15 = vld [vmem:[%s1371_s0 + $0x78] sm:$0xff] }
   0x7   :  { %v36_v16 = vld [vmem:[%s1371_s0 + $0x70] sm:$0xff]  ;;  %v1085_v48 = vld [vmem:[%s1372_s1] ss:$0 sm:$0xff]  ;;  %v1090_v49 = vld [vmem:[%s1372_s1 + $0x1] ss:$0 sm:$0xff] }
   0xa   :  { %66 = vperm.xlu1 %826, %v949_v5   ;;  %61 = vperm.xlu0 %825, %v954_v6  }
   0xe   :  { %76 = vperm.xlu1 %826, %v961_v7   ;;  %71 = vperm.xlu0 %825, %v966_v8  }
  0x12   :  { %86 = vperm.xlu1 %826, %v973_v9   ;;  %81 = vperm.xlu0 %825, %v978_v10  }
  0x16   :  { %96 = vperm.xlu1 %826, %v33_v11   ;;  %91 = vperm.xlu0 %825, %v32_v12  }
  0x1a   :  { %106 = vperm.xlu1 %826, %v991_v13   ;;  %101 = vperm.xlu0 %825, %v34_v14  }
  0x1e   :  { %116 = vperm.xlu1 %826, %v1000_v15   ;;  %111 = vperm.xlu0 %825, %v36_v16  }
  0x22   :  { %828 = vset.pattern.permute.xlu1 %v880_v17  ;;  %827 = vset.pattern.permute.xlu0 %v880_v17 }
  0x23   :  { %161 = vperm.xlu1 %828, %v942_v4   ;;  %157 = vperm.xlu0 %827, %v930_v1  }
  0x27   :  { %165 = vperm.xlu1 %828, %v925_v0   ;;  %169 = vperm.xlu0 %827, %v937_v3  }
  0x2b   :  { %173 = vperm.xlu1 %828, %v954_v6   ;;  %177 = vperm.xlu0 %827, %v949_v5  }
  0x2f   :  { %181 = vperm.xlu1 %828, %v966_v8   ;;  %185 = vperm.xlu0 %827, %v961_v7  }
  0x33   :  { %189 = vperm.xlu1 %828, %v978_v10   ;;  %193 = vperm.xlu0 %827, %v973_v9  }
  0x37   :  { %197 = vperm.xlu1 %828, %v32_v12   ;;  %201 = vperm.xlu0 %827, %v33_v11  }
  0x3b   :  { %205 = vperm.xlu1 %828, %v34_v14   ;;  %209 = vperm.xlu0 %827, %v991_v13  }
  0x3f   :  { %213 = vperm.xlu1 %828, %v36_v16   ;;  %217 = vperm.xlu0 %827, %v1000_v15  }
  0x43   :  { %829 = vset.pattern.permute.xlu1 %v881_v18  ;;  %830 = vset.pattern.permute.xlu0 %v881_v18 }
  0x44   :  { %258 = vperm.xlu1 %829, %v930_v1   ;;  %262 = vperm.xlu0 %830, %v942_v4  }
  0x48   :  { %266 = vperm.xlu1 %829, %v925_v0   ;;  %274 = vperm.xlu0 %830, %v954_v6  }
  0x4c   :  { %270 = vperm.xlu1 %829, %v937_v3   ;;  %282 = vperm.xlu0 %830, %v966_v8  }
  0x50   :  { %278 = vperm.xlu1 %829, %v949_v5   ;;  %290 = vperm.xlu0 %830, %v978_v10  }
  0x54   :  { %286 = vperm.xlu1 %829, %v961_v7   ;;  %298 = vperm.xlu0 %830, %v32_v12  }
  0x58   :  { %294 = vperm.xlu1 %829, %v973_v9   ;;  %306 = vperm.xlu0 %830, %v34_v14  }
  0x5c   :  { %302 = vperm.xlu1 %829, %v33_v11   ;;  %314 = vperm.xlu0 %830, %v36_v16  }
  0x60   :  { %310 = vperm.xlu1 %829, %v991_v13   ;;  %832 = vset.pattern.permute.xlu0 %v882_v19 }
  0x61   :  { %359 = vperm.xlu0 %832, %v930_v1  }
  0x64   :  { %831 = vset.pattern.permute.xlu1 %v882_v19 }
  0x65   :  { %363 = vperm.xlu1 %831, %v942_v4   ;;  %371 = vperm.xlu0 %832, %v937_v3  }
  0x69   :  { %367 = vperm.xlu1 %831, %v925_v0   ;;  %379 = vperm.xlu0 %832, %v949_v5  }
  0x6d   :  { %375 = vperm.xlu1 %831, %v954_v6   ;;  %387 = vperm.xlu0 %832, %v961_v7  }
  0x71   :  { %383 = vperm.xlu1 %831, %v966_v8   ;;  %395 = vperm.xlu0 %832, %v973_v9   ;;  %v1117_v8 = vld [vmem:[%s1372_s1 + $0x2] ss:$0 sm:$0xff] }
  0x75   :  { %391 = vperm.xlu1 %831, %v978_v10   ;;  %403 = vperm.xlu0 %832, %v33_v11  }
  0x79   :  { %399 = vperm.xlu1 %831, %v32_v12   ;;  %415 = vperm.xlu0 %832, %v36_v16  }
  0x7d   :  { %v1039_v20 = vpop.permute.xlu1 %51  ;;  %407 = vperm.xlu1 %831, %v34_v14   ;;  %v42_v21 = vpop.permute.xlu0 %41 }
  0x7e   :  { %v123_v12 = vmul.f32 %v1085_v48, %v42_v21 }
  0x81   :  { %v1041_v22 = vpop.permute.xlu1 %56  ;;  %411 = vperm.xlu1 %831, %v991_v13   ;;  %v1044_v23 = vpop.permute.xlu0 %46 }
  0x85   :  { %v1046_v24 = vpop.permute.xlu1 %66  ;;  %833 = vset.pattern.permute.xlu1 %v881_v18  ;;  %v1048_v25 = vpop.permute.xlu0 %61 }
  0x86   :  { %318 = vperm.xlu1 %833, %v1000_v15  }
  0x89   :  { %v1051_v26 = vpop.permute.xlu1 %76  ;;  %v1053_v27 = vpop.permute.xlu0 %71 }
  0x8a   :  { %834 = vset.pattern.permute.xlu1 %v882_v19  ;;  %v124_v19 = vmul.f32 %v1085_v48, %v1044_v23  ;;  %v1149_v23 = vld [vmem:[%s1373_s2] ss:$0 sm:$0xff] }
  0x8b   :  { %419 = vperm.xlu1 %834, %v1000_v15   ;;  %v1130_v15 = vld [vmem:[%s1372_s1 + $0x3] ss:$0 sm:$0xff] }
  0x8d   :  { %v1056_v28 = vpop.permute.xlu1 %86  ;;  %v1058_v29 = vpop.permute.xlu0 %81 }
  0x91   :  { %v1060_v30 = vpop.permute.xlu1 %96  ;;  %v1062_v31 = vpop.permute.xlu0 %91 }
  0x95   :  { %v107_v32 = vpop.permute.xlu1 %106  ;;  %v1064_v33 = vpop.permute.xlu0 %101 }
  0x96   :  { %v136_v52 = vmul.f32 %v1085_v48, %v107_v32 }
  0x99   :  { %v117_v34 = vpop.permute.xlu1 %116  ;;  %v1066_v35 = vpop.permute.xlu0 %111 }
  0x9a   :  { %v138_v57 = vmul.f32 %v1085_v48, %v117_v34  ;;  %v126_v34 = vmul.f32 %v1085_v48, %v1041_v22  ;;  %v128_v22 = vmul.f32 %v1085_v48, %v1046_v24 }
  0x9e   :  { %v162_v36 = vpop.permute.xlu1 %161  ;;  %v158_v37 = vpop.permute.xlu0 %157 }
  0x9f   :  { %v224_v9 = vmul.f32 %v1090_v49, %v158_v37  ;;  %v225_v14 = vmul.f32 %v1090_v49, %v162_v36 }
  0xa1   :  { %v240_v16 = vadd.f32 %v224_v9, %v123_v12 }
  0xa2   :  { %v166_v38 = vpop.permute.xlu1 %165  ;;  %v170_v39 = vpop.permute.xlu0 %169 }
  0xa3   :  { %v227_v17 = vmul.f32 %v1090_v49, %v170_v39  ;;  %v241_v39 = vadd.f32 %v225_v14, %v124_v19 }
  0xa6   :  { %v1068_v40 = vpop.permute.xlu1 %173  ;;  %v178_v41 = vpop.permute.xlu0 %177 }
  0xaa   :  { %v1070_v42 = vpop.permute.xlu1 %181  ;;  %v1072_v43 = vpop.permute.xlu0 %185 }
  0xae   :  { %v1074_v44 = vpop.permute.xlu1 %189  ;;  %v1076_v45 = vpop.permute.xlu0 %193 }
  0xb2   :  { %v1078_v46 = vpop.permute.xlu1 %197  ;;  %v1080_v47 = vpop.permute.xlu0 %201 }
  0xb6   :  { %v1092_v50 = vpop.permute.xlu1 %205  ;;  %v210_v51 = vpop.permute.xlu0 %209 }
  0xb7   :  { %v237_v53 = vmul.f32 %v1090_v49, %v210_v51 }
  0xb9   :  { %v1096_v54 = vadd.f32 %v237_v53, %v136_v52  ;;  %v125_v52 = vmul.f32 %v1085_v48, %v1039_v20  ;;  %v226_v53 = vmul.f32 %v1090_v49, %v166_v38  ;;  %v130_v20 = vmul.f32 %v1085_v48, %v1051_v26 }
  0xba   :  { %v1098_v55 = vpop.permute.xlu1 %213  ;;  %v218_v56 = vpop.permute.xlu0 %217 }
  0xbb   :  { %v239_v58 = vmul.f32 %v1090_v49, %v218_v56  ;;  %v229_v56 = vmul.f32 %v1090_v49, %v178_v41  ;;  %v242_v14 = vadd.f32 %v226_v53, %v125_v52 }
  0xbd   :  { %v1102_v59 = vadd.f32 %v239_v58, %v138_v57  ;;  %v127_v57 = vmul.f32 %v1085_v48, %v1048_v25  ;;  %v243_v58 = vadd.f32 %v227_v17, %v126_v34  ;;  %v245_v26 = vadd.f32 %v229_v56, %v128_v22 }
  0xbe   :  { %v230_v17 = vmul.f32 %v1090_v49, %v1070_v42  ;;  %v132_v56 = vmul.f32 %v1085_v48, %v1056_v28 }
  0xbf   :  { %v259_v60 = vpop.permute.xlu1 %258  ;;  %v263_v61 = vpop.permute.xlu0 %262 }
  0xc0   :  { %v325_v13 = vmul.f32 %v1117_v8, %v259_v60  ;;  %v326_v32 = vmul.f32 %v1117_v8, %v263_v61 }
  0xc2   :  { %v341_v36 = vadd.f32 %v325_v13, %v240_v16  ;;  %v342_v38 = vadd.f32 %v326_v32, %v241_v39  ;;  %v228_v16 = vmul.f32 %v1090_v49, %v1068_v40 }
  0xc3   :  { %v267_v62 = vpop.permute.xlu1 %266  ;;  %v275_v63 = vpop.permute.xlu0 %274 }
  0xc4   :  { %v327_v41 = vmul.f32 %v1117_v8, %v267_v62  ;;  %v231_v62 = vmul.f32 %v1090_v49, %v1072_v43  ;;  %v329_v34 = vmul.f32 %v1117_v8, %v275_v63  ;;  %v244_v39 = vadd.f32 %v228_v16, %v127_v57 }
  0xc5   :  { %v233_v63 = vmul.f32 %v1090_v49, %v1076_v45  ;;  %v134_v16 = vmul.f32 %v1085_v48, %v1060_v30 }
  0xc6   :  { %v247_v53 = vadd.f32 %v231_v62, %v130_v20 }
  0xc7   :  { %v271_v0 = vpop.permute.xlu1 %270  ;;  %v1104_v1 = vpop.permute.xlu0 %282 }
  0xc8   :  { %v328_v37 = vmul.f32 %v1117_v8, %v271_v0  ;;  %v331_v57 = vmul.f32 %v1117_v8, %v1104_v1  ;;  %v232_v1 = vmul.f32 %v1090_v49, %v1074_v44 }
  0xca   :  { %v344_v12 = vadd.f32 %v328_v37, %v243_v58 }
  0xcb   :  { %v279_v2 = vpop.permute.xlu1 %278  ;;  %v1106_v3 = vpop.permute.xlu0 %290 }
  0xcc   :  { %v330_v61 = vmul.f32 %v1117_v8, %v279_v2  ;;  %v129_v2 = vmul.f32 %v1085_v48, %v1053_v27 }
  0xce   :  { %v246_v22 = vadd.f32 %v230_v17, %v129_v2  ;;  %v333_v2 = vmul.f32 %v1117_v8, %v1106_v3 }
  0xcf   :  { %v287_v4 = vpop.permute.xlu1 %286  ;;  %v1108_v5 = vpop.permute.xlu0 %298 }
  0xd0   :  { %v332_v40 = vmul.f32 %v1117_v8, %v287_v4  ;;  %v347_v44 = vadd.f32 %v331_v57, %v246_v22 }
  0xd2   :  { %v348_v20 = vadd.f32 %v332_v40, %v247_v53 }
  0xd3   :  { %v1110_v6 = vpop.permute.xlu1 %294  ;;  %v1112_v7 = vpop.permute.xlu0 %306 }
  0xd4   :  { %v334_v45 = vmul.f32 %v1117_v8, %v1110_v6  ;;  %v235_v6 = vmul.f32 %v1090_v49, %v1080_v47 }
  0xd7   :  { %v1120_v10 = vpop.permute.xlu1 %302  ;;  %v1122_v11 = vpop.permute.xlu0 %314 }
  0xd8   :  { %v336_v17 = vmul.f32 %v1117_v8, %v1120_v10  ;;  %v234_v10 = vmul.f32 %v1090_v49, %v1078_v46 }
  0xdb   :  { %v1133_v18 = vpop.permute.xlu1 %310 }
  0xdc   :  { %v360_v21 = vpop.permute.xlu0 %359 }
  0xdd   :  { %v426_v51 = vmul.f32 %v1130_v15, %v360_v21  ;;  %v343_v21 = vadd.f32 %v327_v41, %v242_v14  ;;  %v345_v41 = vadd.f32 %v329_v34, %v244_v39  ;;  %v131_v14 = vmul.f32 %v1085_v48, %v1058_v29 }
  0xde   :  { %v335_v39 = vmul.f32 %v1117_v8, %v1108_v5 }
  0xdf   :  { %v1155_v60 = vadd.f32 %v426_v51, %v341_v36  ;;  %v346_v36 = vadd.f32 %v330_v61, %v245_v26 }
  0xe0   :  { %v364_v0 = vpop.permute.xlu1 %363  ;;  %v372_v9 = vpop.permute.xlu0 %371 }
  0xe1   :  { %v427_v13 = vmul.f32 %v1130_v15, %v364_v0  ;;  %v429_v24 = vmul.f32 %v1130_v15, %v372_v9  ;;  %v465_v25 = vmul.f32 %v1149_v23, %v1155_v60 }
  0xe3   :  { %v1173_v19 = vadd.f32 %v427_v13, %v342_v38  ;;  %v1175_v32 = vadd.f32 %v429_v24, %v344_v12  ;;  %481 = vadd.xlane.f32.xlu1 %v465_v25  ;;  %v249_v24 = vadd.f32 %v233_v63, %v132_v56 }
  0xe4   :  { %v368_v37 = vpop.permute.xlu1 %367  ;;  %v380_v51 = vpop.permute.xlu0 %379 }
  0xe5   :  { %v773_v43 = vpack.c.bf16 %v1173_v19, %v1155_v60  ;;  %v428_v27 = vmul.f32 %v1130_v15, %v368_v37  ;;  %v431_v42 = vmul.f32 %v1130_v15, %v380_v51  ;;  %v466_v52 = vmul.f32 %v1149_v23, %v1173_v19 }
  0xe6   :  { %v468_v4 = vmul.f32 %v1149_v23, %v1175_v32  ;;  %v350_v47 = vadd.f32 %v334_v45, %v249_v24  ;;  %v248_v37 = vadd.f32 %v232_v1, %v131_v14  ;;  %v251_v51 = vadd.f32 %v235_v6, %v134_v16 }
  0xe7   :  { %774 = vst [vmem:[#allocation2] sm:$0xff] %v773_v43   ;;  %v1191_v58 = vadd.f32 %v428_v27, %v343_v21  ;;  %v1193_v38 = vadd.f32 %v431_v42, %v346_v36  ;;  %483 = vadd.xlane.f32.xlu0 %v466_v52  ;;  %v133_v42 = vmul.f32 %v1085_v48, %v1062_v31 }
  0xe8   :  { %487 = vadd.xlane.f32.xlu1 %v468_v4  ;;  %v376_v61 = vpop.permute.xlu1 %375  ;;  %v388_v0 = vpop.permute.xlu0 %387  ;;  %v349_v52 = vadd.f32 %v333_v2, %v248_v37  ;;  %v352_v53 = vadd.f32 %v336_v17, %v251_v51  ;;  %v236_v31 = vmul.f32 %v1090_v49, %v1092_v50  ;;  %v338_v16 = vmul.f32 %v1117_v8, %v1133_v18 }
  0xe9   :  { %v778_v28 = vpack.c.bf16 %v1175_v32, %v1191_v58  ;;  %v430_v9 = vmul.f32 %v1130_v15, %v376_v61  ;;  %v433_v12 = vmul.f32 %v1130_v15, %v388_v0  ;;  %v467_v13 = vmul.f32 %v1149_v23, %v1191_v58 }
  0xea   :  { %v470_v25 = vmul.f32 %v1149_v23, %v1193_v38  ;;  %v250_v57 = vadd.f32 %v234_v10, %v133_v42  ;;  %v135_v61 = vmul.f32 %v1085_v48, %v1064_v33  ;;  %v238_v0 = vmul.f32 %v1090_v49, %v1098_v55  ;;  %v737_v10 = vld [vmem:[%s1374_s3] ss:$0 sm:$0xff]  ;;  %s883_s3 = smov [#allocation2]  }
  0xeb   :  { %810 = vst [vmem:[#allocation2 + $0x8] sm:$0xff] %v778_v28   ;;  %v1215_v26 = vadd.f32 %v430_v9, %v345_v41  ;;  %v1217_v62 = vadd.f32 %v433_v12, %v348_v20  ;;  %485 = vadd.xlane.f32.xlu0 %v467_v13  ;;  %v337_v28 = vmul.f32 %v1117_v8, %v1112_v7  ;;  %s703_s14 = sshll.u32 %s883_s3, 4  ;;  %s704_s14 = int_to_ptr.vmem [resolvable:$true] %s703_s14 }
  0xec   :  { %491 = vadd.xlane.f32.xlu1 %v470_v25  ;;  %v384_v21 = vpop.permute.xlu1 %383  ;;  %v396_v29 = vpop.permute.xlu0 %395  ;;  %v351_v9 = vadd.f32 %v335_v39, %v250_v57  ;;  %v137_v33 = vmul.f32 %v1085_v48, %v1066_v35  ;;  %v252_v24 = vadd.f32 %v236_v31, %v135_v61  ;;  %v339_v55 = vmul.f32 %v1117_v8, %v1122_v11  ;;  %s835_s15 = scalar_lea.vmem %s704_s14, 1024  ;;  %p840_p1 = scmp.lt.s32.totalorder %s704_s14, %s704_s14 }
  0xed   :  { %v783_v30 = vpack.c.bf16 %v1193_v38, %v1215_v26  ;;  %v432_v34 = vmul.f32 %v1130_v15, %v384_v21  ;;  %v435_v36 = vmul.f32 %v1130_v15, %v396_v29  ;;  %v469_v40 = vmul.f32 %v1149_v23, %v1215_v26  ;;  %p836_p0 = scmp.ne.s32.totalorder %s704_s14, %s835_s15  ;;  %p841_p2 = scmp.lt.s32.totalorder %s835_s15, %s835_s15 }
  0xee   :  { %v472_v3 = vmul.f32 %v1149_v23, %v1217_v62  ;;  %v254_v25 = vadd.f32 %v238_v0, %v137_v33  ;;  %v353_v14 = vadd.f32 %v337_v28, %v252_v24  ;;  %v354_v29 = vadd.f32 %v338_v16, %v1096_v54 }
  0xef   :  { %811 = vst [vmem:[#allocation2 + $0x10] sm:$0xff] %v783_v30   ;;  %v1233_v43 = vadd.f32 %v432_v34, %v347_v44  ;;  %v1235_v27 = vadd.f32 %v435_v36, %v350_v47  ;;  %489 = vadd.xlane.f32.xlu0 %v469_v40  ;;  %v520_v42 = vmul.f32 %v737_v10, %v1155_v60  ;;  %p842_p3 = por %p841_p2, %p840_p1 }
  0xf0   :  { %495 = vadd.xlane.f32.xlu1 %v472_v3  ;;  %v392_v63 = vpop.permute.xlu1 %391  ;;  %v404_v4 = vpop.permute.xlu0 %403  ;;  %v355_v17 = vadd.f32 %v339_v55, %v254_v25  ;;  %v521_v60 = vmul.f32 %v737_v10, %v1173_v19 }
  0xf1   :  { %v788_v46 = vpack.c.bf16 %v1217_v62, %v1233_v43  ;;  %v434_v56 = vmul.f32 %v1130_v15, %v392_v63  ;;  %v437_v22 = vmul.f32 %v1130_v15, %v404_v4  ;;  %v471_v41 = vmul.f32 %v1149_v23, %v1233_v43  ;;  %p843_p4 = pnand %p842_p3, %p836_p0 }
  0xf2   :  { %v474_v5 = vmul.f32 %v1149_v23, %v1235_v27  ;;  %v522_v4 = vmul.f32 %v737_v10, %v1191_v58  ;;  %v529_v19 = vmul.f32 %v737_v10, %v1235_v27 }
  0xf3   :  { %812 = vst [vmem:[#allocation2 + $0x18] sm:$0xff] %v788_v46   ;;  %v1251_v20 = vadd.f32 %v434_v56, %v349_v52  ;;  %v1253_v45 = vadd.f32 %v437_v22, %v352_v53  ;;  %493 = vadd.xlane.f32.xlu0 %v471_v41  ;;  %v525_v22 = vmul.f32 %v737_v10, %v1193_v38 }
  0xf4   :  { %499 = vadd.xlane.f32.xlu1 %v474_v5  ;;  %v400_v50 = vpop.permute.xlu1 %399  ;;  %v416_v6 = vpop.permute.xlu0 %415 }
  0xf5   :  { %v793_v12 = vpack.c.bf16 %v1235_v27, %v1251_v20  ;;  %v436_v13 = vmul.f32 %v1130_v15, %v400_v50  ;;  %v473_v1 = vmul.f32 %v1149_v23, %v1251_v20  ;;  %v476_v49 = vmul.f32 %v1149_v23, %v1253_v45 }
  0xf6   :  { %v440_v48 = vmul.f32 %v1130_v15, %v416_v6  ;;  %v528_v58 = vmul.f32 %v737_v10, %v1251_v20 }
  0xf7   :  { %813 = vst [vmem:[#allocation2 + $0x20] sm:$0xff] %v793_v12   ;;  %v452_v7 = vadd.f32 %v436_v13, %v351_v9  ;;  %497 = vadd.xlane.f32.xlu0 %v473_v1 }
  0xf8   :  { %503 = vadd.xlane.f32.xlu1 %v476_v49  ;;  %v408_v44 = vpop.permute.xlu1 %407  ;;  %v456_v30 = vadd.f32 %v440_v48, %v355_v17 }
  0xf9   :  { %v798_v35 = vpack.c.bf16 %v1253_v45, %v452_v7  ;;  %v438_v2 = vmul.f32 %v1130_v15, %v408_v44  ;;  %v475_v47 = vmul.f32 %v1149_v23, %v452_v7 }
  0xfa   :  { %v479_v3 = vmul.f32 %v1149_v23, %v456_v30 }
  0xfb   :  { %814 = vst [vmem:[#allocation2 + $0x28] sm:$0xff] %v798_v35   ;;  %v454_v11 = vadd.f32 %v438_v2, %v353_v14  ;;  %501 = vadd.xlane.f32.xlu0 %v475_v47 }
  0xfc   :  { %v412_v21 = vpop.permute.xlu1 %411 }
  0xfd   :  { %v439_v18 = vmul.f32 %v1130_v15, %v412_v21  ;;  %v477_v34 = vmul.f32 %v1149_v23, %v454_v11  ;;  %v532_v41 = vmul.f32 %v737_v10, %v454_v11 }
  0xff   :  { %v455_v36 = vadd.f32 %v439_v18, %v354_v29  ;;  %505 = vadd.xlane.f32.xlu0 %v477_v34 }
 0x101   :  { %v803_v40 = vpack.c.bf16 %v455_v36, %v454_v11  ;;  %v319_v37 = vpop.permute.xlu1 %318  ;;  %v478_v51 = vmul.f32 %v1149_v23, %v455_v36  ;;  %v533_v31 = vmul.f32 %v737_v10, %v455_v36 }
 0x102   :  { %v340_v54 = vmul.f32 %v1117_v8, %v319_v37  ;;  %v524_v8 = vmul.f32 %v737_v10, %v1215_v26  ;;  %v527_v26 = vmul.f32 %v737_v10, %v1217_v62 }
 0x103   :  { %815 = vst [vmem:[#allocation2 + $0x30] sm:$0xff] %v803_v40   ;;  %507 = vadd.xlane.f32.xlu1 %v478_v51  ;;  %509 = vadd.xlane.f32.xlu0 %v479_v3 }
 0x104   :  { %v356_v39 = vadd.f32 %v340_v54, %v1102_v59  ;;  %v526_v59 = vmul.f32 %v737_v10, %v1233_v43  ;;  %v534_v43 = vmul.f32 %v737_v10, %v456_v30 }
 0x106   :  { %v420_v52 = vpop.permute.xlu1 %419 }
 0x107   :  { %v441_v53 = vmul.f32 %v1130_v15, %v420_v52  ;;  %536 = vadd.xlane.f32.xlu0 %v520_v42  ;;  %v523_v15 = vmul.f32 %v737_v10, %v1175_v32  ;;  %v531_v32 = vmul.f32 %v737_v10, %v1253_v45 }
 0x109   :  { %v457_v63 = vadd.f32 %v441_v53, %v356_v39 }
 0x10b   :  { %v808_v46 = vpack.c.bf16 %v457_v63, %v456_v30  ;;  %540 = vadd.xlane.f32.xlu0 %v522_v4  ;;  %v480_v56 = vmul.f32 %v1149_v23, %v457_v63  ;;  %v530_v23 = vmul.f32 %v737_v10, %v452_v7  ;;  %v535_v5 = vmul.f32 %v737_v10, %v457_v63 }
 0x10d   :  { %816 = vst [vmem:[#allocation2 + $0x38] sm:$0xff] %v808_v46   ;;  %511 = vadd.xlane.f32.xlu1 %v480_v56 }
 0x10f   :  { %544 = vadd.xlane.f32.xlu0 %v524_v8 }
 0x111   :  { %538 = vadd.xlane.f32.xlu1 %v521_v60 }
 0x113   :  { %548 = vadd.xlane.f32.xlu0 %v526_v59 }
 0x115   :  { %542 = vadd.xlane.f32.xlu1 %v523_v15 }
 0x117   :  { %552 = vadd.xlane.f32.xlu0 %v528_v58 }
 0x119   :  { %546 = vadd.xlane.f32.xlu1 %v525_v22 }
 0x11b   :  { %556 = vadd.xlane.f32.xlu0 %v530_v23 }
 0x11d   :  { %550 = vadd.xlane.f32.xlu1 %v527_v26 }
 0x11f   :  { %560 = vadd.xlane.f32.xlu0 %v532_v41 }
 0x121   :  { %554 = vadd.xlane.f32.xlu1 %v529_v19 }
 0x123   :  { %564 = vadd.xlane.f32.xlu0 %v534_v43 }
 0x125   :  { %558 = vadd.xlane.f32.xlu1 %v531_v32 }
 0x129   :  { %562 = vadd.xlane.f32.xlu1 %v533_v31 }
 0x12d   :  { %566 = vadd.xlane.f32.xlu1 %v535_v5 }
 0x16c   :  { %v482_v38 = vpop.xlane.xlu1 %481 }
 0x16d   :  { %846 = shalt.err (!%p843_p4)
}
 0x16e   :  { %s884_s16 = smov 64   ;;  %s885_s17 = smov 4   ;;  %648 = vxpose.xlu0.b32.start [1/16] (narrow) %v482_v38, 8  ;;  %vm681_vm0 = vcmask 7168  }
 0x16f   :  { %709 = dma.vmem_to_hbm [thread:$0]  %s704_s14, 1024, %s1375_s4, [#allocation3], %s884_s16, %s884_s16, %s885_s17  }
 0x170   :  { %v484_v62 = vpop.xlane.xlu0 %483  ;;  %s886_s22 = smov [#allocation4]  }
 0x171   :  { %v488_v57 = vpop.xlane.xlu1 %487  ;;  %s716_s23 = sshll.u32 %s886_s22, 4  ;;  %s717_s23 = int_to_ptr.vmem [resolvable:$true] %s716_s23 }
 0x172   :  { %649 = vxpose.xlu0.b32.cont [2/16] (narrow) %v484_v62, 8  ;;  %s855_s24 = scalar_lea.vmem %s717_s23, 16  ;;  %s859_s25 = scalar_lea.vmem %s717_s23, 32 }
 0x173   :  { %p856_p5 = scmp.ne.s32.totalorder %s717_s23, %s855_s24  ;;  %p860_p6 = scmp.lt.s32.totalorder %s717_s23, %s717_s23 }
 0x174   :  { %v486_v27 = vpop.xlane.xlu0 %485  ;;  %p861_p7 = scmp.lt.s32.totalorder %s859_s25, %s855_s24 }
 0x175   :  { %v492_v45 = vpop.xlane.xlu1 %491 }
 0x176   :  { %650 = vxpose.xlu0.b32.cont [3/16] (narrow) %v486_v27, 8  ;;  %p862_p8 = por %p861_p7, %p860_p6 }
 0x178   :  { %v490_v20 = vpop.xlane.xlu0 %489  ;;  %p863_p9 = pnand %p862_p8, %p856_p5 }
 0x179   :  { %v496_v28 = vpop.xlane.xlu1 %495 }
 0x17a   :  { %651 = vxpose.xlu0.b32.cont [4/16] (narrow) %v488_v57, 8 }
 0x17c   :  { %v494_v61 = vpop.xlane.xlu0 %493 }
 0x17d   :  { %v500_v9 = vpop.xlane.xlu1 %499 }
 0x17e   :  { %652 = vxpose.xlu0.b32.cont [5/16] (narrow) %v490_v20, 8 }
 0x180   :  { %v498_v0 = vpop.xlane.xlu0 %497 }
 0x181   :  { %v504_v1 = vpop.xlane.xlu1 %503 }
 0x182   :  { %653 = vxpose.xlu0.b32.cont [6/16] (narrow) %v492_v45, 8 }
 0x184   :  { %v502_v50 = vpop.xlane.xlu0 %501 }
 0x186   :  { %654 = vxpose.xlu0.b32.cont [7/16] (narrow) %v494_v61, 8 }
 0x188   :  { %v506_v12 = vpop.xlane.xlu0 %505 }
 0x18a   :  { %655 = vxpose.xlu0.b32.cont [8/16] (narrow) %v496_v28, 8 }
 0x18c   :  { %v510_v13 = vpop.xlane.xlu0 %509  ;;  %v508_v24 = vpop.xlane.xlu1 %507 }
 0x18e   :  { %656 = vxpose.xlu0.b32.cont [9/16] (narrow) %v498_v0, 8 }
 0x190   :  { %v537_v33 = vpop.xlane.xlu0 %536 }
 0x191   :  { %682 = vst.msk [vmem:[%s1377_s6] sm:$0xff] %vm681_vm0, %v537_v33 }
 0x192   :  { %657 = vxpose.xlu0.b32.cont [10/16] (narrow) %v500_v9, 8 }
 0x194   :  { %v541_v6 = vpop.xlane.xlu0 %540 }
 0x195   :  { %684 = vst.msk [vmem:[%s1377_s6 + $0x10] sm:$0xff] %vm681_vm0, %v541_v6 }
 0x196   :  { %658 = vxpose.xlu0.b32.cont [11/16] (narrow) %v502_v50, 8  ;;  %v512_v49 = vpop.xlane.xlu1 %511 }
 0x198   :  { %v545_v55 = vpop.xlane.xlu0 %544 }
 0x199   :  { %686 = vst.msk [vmem:[%s1377_s6 + $0x20] sm:$0xff] %vm681_vm0, %v545_v55 }
 0x19a   :  { %659 = vxpose.xlu0.b32.cont [12/16] (narrow) %v504_v1, 8  ;;  %v539_v7 = vpop.xlane.xlu1 %538 }
 0x19b   :  { %683 = vst.msk [vmem:[%s1377_s6 + $0x8] sm:$0xff] %vm681_vm0, %v539_v7 }
 0x19c   :  { %v549_v25 = vpop.xlane.xlu0 %548 }
 0x19d   :  { %688 = vst.msk [vmem:[%s1377_s6 + $0x30] sm:$0xff] %vm681_vm0, %v549_v25 }
 0x19e   :  { %660 = vxpose.xlu0.b32.cont [13/16] (narrow) %v506_v12, 8  ;;  %v543_v14 = vpop.xlane.xlu1 %542 }
 0x19f   :  { %685 = vst.msk [vmem:[%s1377_s6 + $0x18] sm:$0xff] %vm681_vm0, %v543_v14 }
 0x1a0   :  { %v553_v16 = vpop.xlane.xlu0 %552 }
 0x1a1   :  { %690 = vst.msk [vmem:[%s1377_s6 + $0x40] sm:$0xff] %vm681_vm0, %v553_v16 }
 0x1a2   :  { %661 = vxpose.xlu0.b32.cont [14/16] (narrow) %v508_v24, 8  ;;  %v547_v44 = vpop.xlane.xlu1 %546 }
 0x1a3   :  { %687 = vst.msk [vmem:[%s1377_s6 + $0x28] sm:$0xff] %vm681_vm0, %v547_v44 }
 0x1a4   :  { %v557_v35 = vpop.xlane.xlu0 %556 }
 0x1a5   :  { %692 = vst.msk [vmem:[%s1377_s6 + $0x50] sm:$0xff] %vm681_vm0, %v557_v35 }
 0x1a6   :  { %662 = vxpose.xlu0.b32.cont [15/16] (narrow) %v510_v13, 8  ;;  %v551_v48 = vpop.xlane.xlu1 %550 }
 0x1a7   :  { %689 = vst.msk [vmem:[%s1377_s6 + $0x38] sm:$0xff] %vm681_vm0, %v551_v48 }
 0x1a8   :  { %v561_v2 = vpop.xlane.xlu0 %560 }
 0x1a9   :  { %694 = vst.msk [vmem:[%s1377_s6 + $0x60] sm:$0xff] %vm681_vm0, %v561_v2 }
 0x1aa   :  { %663 = vxpose.xlu0.b32.end [16/16] (narrow) %v512_v49, 8  ;;  %v555_v47 = vpop.xlane.xlu1 %554 }
 0x1ab   :  { %691 = vst.msk [vmem:[%s1377_s6 + $0x48] sm:$0xff] %vm681_vm0, %v555_v47 }
 0x1ac   :  { %v565_v17 = vpop.xlane.xlu0 %564 }
 0x1ad   :  { %696 = vst.msk [vmem:[%s1377_s6 + $0x70] sm:$0xff] %vm681_vm0, %v565_v17 }
 0x1ae   :  { %v559_v11 = vpop.xlane.xlu1 %558 }
 0x1af   :  { %693 = vst.msk [vmem:[%s1377_s6 + $0x58] sm:$0xff] %vm681_vm0, %v559_v11 }
 0x1b2   :  { %v563_v21 = vpop.xlane.xlu1 %562 }
 0x1b3   :  { %695 = vst.msk [vmem:[%s1377_s6 + $0x68] sm:$0xff] %vm681_vm0, %v563_v21 }
 0x1b6   :  { %v567_v29 = vpop.xlane.xlu1 %566 }
 0x1b7   :  { %697 = vst.msk [vmem:[%s1377_s6 + $0x78] sm:$0xff] %vm681_vm0, %v567_v29 }
 0x1ea   :  { %v664_v30 = vpop.trf.xlu0 }
 0x1eb   :  { %680 = vst [vmem:[#allocation4] sm:$0x1] %v664_v30 }
 0x1ec   :  { %866 = shalt.err (!%p863_p9)
}
 0x1ed   :  { %719 = dma.vmem_to_hbm [thread:$0]  %s717_s23, 16, %s1376_s5, [#allocation5]  }
 0x1ee   :  { %875 = dma.done.wait [#allocation3], 1024  }
 0x1ef   :  { %876 = vsyncadd [#allocation3], 4294966272 }
 0x1f0   :  { %877 = dma.done.wait [#allocation5], 16  }
 0x1f1   :  { %878 = vsyncadd [#allocation5], 4294967280 }
 0x1f2   :  { %730 = vsyncpa [#allocation3], 1 }
 0x1f3   :  { %731 = vsyncpa [#allocation5], 1 }

</bundles_post_ra>
